<compile_context>
chip_gen: v7x
topology: tpu7x:2x2x1
jax: 0.10.0
libtpu: 0.0.40
codegen_flags: <defaults>
</compile_context>

<pallas_src>
import jax
import jax.numpy as jnp
from jax import lax
from jax.experimental import pallas as pl
from jax.experimental.pallas import tpu as pltpu

_EPS = 1e-6


# ----------------------------------------------------------------------------
# Tiling helpers
# ----------------------------------------------------------------------------
def _round_up(v: int, m: int) -> int:
    return ((v + m - 1) // m) * m


def _choose_tile(dim: int, pref: int, mult: int) -> int:
    """Tile size that is a multiple of `mult`, at most `pref` (rounded down to a
    multiple of `mult`), and never larger than `dim` padded up to `mult`."""
    pref_m = max((pref // mult) * mult, mult)
    return min(pref_m, _round_up(max(dim, 1), mult))


def _logits_vmem_estimate(tt: int, tv: int, ch: int, out_itemsize: int) -> int:
    # Double-buffered inputs/outputs + single bf16 scratch.
    return (2 * (tt * ch * 4          # x tile (f32)
                 + 2 * ch * 4         # shift + (1+scale)
                 + tv * ch * 2        # weight tile (bf16, torch layout)
                 + tv * 4             # bias tile
                 + tt * tv * out_itemsize)   # output tile
            + tt * ch * 2)            # xm scratch (bf16)


# ----------------------------------------------------------------------------
# Kernels
# ----------------------------------------------------------------------------
def _logits_kernel(x_ref, shift_ref, scale_p1_ref, w_ref, b_ref, o_ref, xm_ref):
    # x_ref:        (1, tt, ch)  f32
    # shift_ref:    (1, 1, ch)   f32   (per-batch adaLN shift, precomputed)
    # scale_p1_ref: (1, 1, ch)   f32   (per-batch 1 + scale, precomputed)
    # w_ref:        (tv, ch)     bf16  (torch-layout weight tile, NOT transposed)
    # b_ref:        (1, tv)      f32
    # o_ref:        (1, tt, tv)  f32 or bf16
    # xm_ref:       (tt, ch)     bf16  VMEM scratch (modulated activations cache)

    # LayerNorm + modulate + bf16 cast exactly ONCE per (batch, token) tile; the
    # result is cached in VMEM and reused across the innermost ("arbitrary") vocab sweep.
    @pl.when(pl.program_id(2) == 0)
    def _():
        x = x_ref[0]                                             # (tt, ch) f32
        mu = jnp.mean(x, axis=-1, keepdims=True)
        var = jnp.mean(x * x, axis=-1, keepdims=True) - mu * mu  # one-pass variance
        xn = (x - mu) * lax.rsqrt(var + _EPS)
        xm_ref[...] = (xn * scale_p1_ref[0] + shift_ref[0]).astype(xm_ref.dtype)

    # MXU: bf16 x bf16 -> f32 accumulation, contracting on ch with the weight kept
    # in torch (n_vocab, ch) layout (no host-side transpose ever happens).
    logits = lax.dot_general(
        xm_ref[...], w_ref[...],
        dimension_numbers=(((1,), (1,)), ((), ())),
        preferred_element_type=jnp.float32) + b_ref[...]
    o_ref[0] = logits.astype(o_ref.dtype)


def _modulate_kernel(x_ref, shift_ref, scale_p1_ref, o_ref):
    # return_logits=False path: LayerNorm + modulate only (all f32, mem-bound).
    x = x_ref[0]
    mu = jnp.mean(x, axis=-1, keepdims=True)
    var = jnp.mean(x * x, axis=-1, keepdims=True) - mu * mu
    xn = (x - mu) * lax.rsqrt(var + _EPS)
    o_ref[0] = (xn * scale_p1_ref[0] + shift_ref[0]).astype(o_ref.dtype)


# ----------------------------------------------------------------------------
# Wrapper
# ----------------------------------------------------------------------------
def final_layer_pallas(x, c, params, *, return_logits=True,
                       token_tile_pref=256, vocab_tile_pref=1024,
                       logits_dtype=jnp.float32):
    n_b, n_t, ch = x.shape
    x = x.astype(jnp.float32)
    c = c.astype(jnp.float32)

    # adaLN modulation hoisted to plain JAX: tiny (n_b,1,ch)x(ch,2ch) matvec.
    w_ad = params["w_ad"].astype(jnp.float32)                 # (2*ch, ch)
    b_ad = params["b_ad"].astype(jnp.float32)                 # (2*ch,)
    cm = jax.nn.selu(c) @ w_ad.T + b_ad                       # (n_b, 1, 2*ch)
    shift, scale = jnp.split(cm, 2, axis=-1)                  # (n_b, 1, ch) each
    scale_p1 = 1.0 + scale                                    # kernel does one FMA

    # ---------------- embedding path (return_logits=False) ----------------
    if not return_logits:
        # Pure mem-bound elementwise kernel: large token tiles (512-1024 rows) reach
        # ~85% of HBM roofline; bound the double-buffered in+out f32 tiles to ~24 MiB.
        budget_rows = max(8, ((24 << 20) // (16 * ch) // 8) * 8)
        tt = _choose_tile(n_t, min(1024, budget_rows), 8)
        n_t_pad = _round_up(n_t, tt)
        xp = x if n_t_pad == n_t else jnp.pad(x, ((0, 0), (0, n_t_pad - n_t), (0, 0)))
        vmem_limit = min(64 << 20, max(32 << 20, 16 * tt * ch + (4 << 20)))
        out = pl.pallas_call(
            _modulate_kernel,
            out_shape=jax.ShapeDtypeStruct((n_b, n_t_pad, ch), jnp.float32),
            grid_spec=pltpu.PrefetchScalarGridSpec(
                num_scalar_prefetch=0,
                grid=(n_b, n_t_pad // tt),
                in_specs=[
                    pl.BlockSpec((1, tt, ch), lambda b, i: (b, i, 0)),   # x
                    pl.BlockSpec((1, 1, ch), lambda b, i: (b, 0, 0)),    # shift
                    pl.BlockSpec((1, 1, ch), lambda b, i: (b, 0, 0)),    # 1+scale
                ],
                out_specs=pl.BlockSpec((1, tt, ch), lambda b, i: (b, i, 0)),
            ),
            compiler_params=pltpu.CompilerParams(
                dimension_semantics=("parallel", "parallel"),
                vmem_limit_bytes=vmem_limit),
        )(xp, shift, scale_p1)
        return out if n_t_pad == n_t else out[:, :n_t, :]

    # ---------------- logits path (return_logits=True) ----------------
    w = params["w"]                                           # torch layout (n_vocab, ch)
    b = params["b"]                                           # (n_vocab,)
    n_v = w.shape[0]
    if w.dtype != jnp.bfloat16:
        # One-time fallback cast; store the weight pre-cast to bf16 in params to avoid
        # this extra full-weight HBM pass on every invocation.
        w = w.astype(jnp.bfloat16)
    bias = b.reshape(1, n_v).astype(jnp.float32)

    out_itemsize = jnp.dtype(logits_dtype).itemsize
    tt = _choose_tile(n_t, token_tile_pref, 8)
    tv = _choose_tile(n_v, vocab_tile_pref, 128)
    # Keep the double-buffered working set under a v7x-safe budget (64 MiB physical).
    budget = 48 << 20
    while _logits_vmem_estimate(tt, tv, ch, out_itemsize) > budget and tv > 128:
        tv //= 2

    n_t_pad = _round_up(n_t, tt)
    n_v_pad = _round_up(n_v, tv)
    xp = x if n_t_pad == n_t else jnp.pad(x, ((0, 0), (0, n_t_pad - n_t), (0, 0)))
    if n_v_pad != n_v:
        w = jnp.pad(w, ((0, n_v_pad - n_v), (0, 0)))
        bias = jnp.pad(bias, ((0, 0), (0, n_v_pad - n_v)))

    est = _logits_vmem_estimate(tt, tv, ch, out_itemsize)
    vmem_limit = min(64 << 20, max(32 << 20, 2 * est))

    grid_spec = pltpu.PrefetchScalarGridSpec(
        num_scalar_prefetch=0,
        # Vocab axis INNERMOST + "arbitrary": the modulated bf16 x tile is computed
        # once per (batch, token) tile (pl.when(j == 0)) and stays resident in the
        # VMEM scratch for the whole vocab sweep; x / shift / scale block indices are
        # constant along j so they are not re-fetched.
        grid=(n_b, n_t_pad // tt, n_v_pad // tv),
        in_specs=[
            pl.BlockSpec((1, tt, ch), lambda bi, i, j: (bi, i, 0)),   # x (f32)
            pl.BlockSpec((1, 1, ch), lambda bi, i, j: (bi, 0, 0)),    # shift
            pl.BlockSpec((1, 1, ch), lambda bi, i, j: (bi, 0, 0)),    # 1+scale
            pl.BlockSpec((tv, ch), lambda bi, i, j: (j, 0)),          # W tile (torch layout, bf16)
            pl.BlockSpec((1, tv), lambda bi, i, j: (0, j)),           # bias tile
        ],
        out_specs=pl.BlockSpec((1, tt, tv), lambda bi, i, j: (bi, i, j)),
        scratch_shapes=[pltpu.VMEM((tt, ch), jnp.bfloat16)],          # cached modulated x
    )
    out = pl.pallas_call(
        _logits_kernel,
        out_shape=jax.ShapeDtypeStruct((n_b, n_t_pad, n_v_pad), logits_dtype),
        grid_spec=grid_spec,
        compiler_params=pltpu.CompilerParams(
            dimension_semantics=("parallel", "parallel", "arbitrary"),
            vmem_limit_bytes=vmem_limit),
    )(xp, shift, scale_p1, w, bias)
    if n_t_pad != n_t or n_v_pad != n_v:
        out = out[:, :n_t, :n_v]
    return out


# ----------------------------------------------------------------------------
# Pure-JAX references (mirror the PyTorch forward)
# ----------------------------------------------------------------------------
def final_layer_reference(x, c, params, return_logits=True):
    cm = jax.nn.selu(c) @ params["w_ad"].T + params["b_ad"]
    shift, scale = jnp.split(cm, 2, axis=-1)
    mu = jnp.mean(x, -1, keepdims=True)
    var = jnp.mean((x - mu) ** 2, -1, keepdims=True)
    xm = (x - mu) * lax.rsqrt(var + _EPS) * (1.0 + scale) + shift
    if return_logits:
        return xm @ params["w"].T + params["b"]
    return xm


def final_layer_reference_bf16(x, c, params):
    # Mirrors the kernel's precision: f32 layernorm/modulation, bf16 MXU operands,
    # f32 accumulation.
    n_b, n_t, ch = x.shape
    cm = jax.nn.selu(c) @ params["w_ad"].T + params["b_ad"]
    shift, scale = jnp.split(cm, 2, axis=-1)
    mu = jnp.mean(x, -1, keepdims=True)
    var = jnp.mean((x - mu) ** 2, -1, keepdims=True)
    xm = (x - mu) * lax.rsqrt(var + _EPS) * (1.0 + scale) + shift
    logits = jnp.dot(xm.reshape(-1, ch).astype(jnp.bfloat16),
                     params["w"].T.astype(jnp.bfloat16),
                     preferred_element_type=jnp.float32)
    return logits.reshape(n_b, n_t, -1) + params["b"]


if __name__ == "__main__":
    n_b, n_t, ch, n_vocab = 2, 8, 32, 64

    key = jax.random.PRNGKey(0)
    ks = jax.random.split(key, 6)

    x = jax.random.normal(ks[0], (n_b, n_t, ch), jnp.float32)
    c = jax.random.normal(ks[1], (n_b, 1, ch), jnp.float32)

    def w(k_, shape, s=0.05):
        return s * jax.random.normal(k_, shape, jnp.float32)

    # NOTE: the PyTorch module zero-inits both linears (output would be all-zero at
    # init); deterministic random weights are used to exercise the full path.
    params_f32 = {
        "w": w(ks[2], (n_vocab, ch)),          # final projection weight (torch layout)
        "b": w(ks[3], (n_vocab,), 0.02),
        "w_ad": w(ks[4], (2 * ch, ch)),        # adaLN Linear weight
        "b_ad": w(ks[5], (2 * ch,), 0.02),
    }
    # Device params: projection weight pre-cast to bf16 (no per-call cast/transpose).
    params_dev = dict(params_f32)
    params_dev["w"] = params_f32["w"].astype(jnp.bfloat16)

    # --- logits path (return_logits=True, the default) ---
    out = final_layer_pallas(x, c, params_dev, return_logits=True)
    out = jax.block_until_ready(out)
    assert out.shape == (n_b, n_t, n_vocab)
    assert out.dtype == jnp.float32

    ref_bf16 = final_layer_reference_bf16(x, c, params_f32)   # same precision as kernel
    ref_f32 = final_layer_reference(x, c, params_f32, return_logits=True)
    err_bf16 = float(jnp.max(jnp.abs(out - ref_bf16)))
    err_f32 = float(jnp.max(jnp.abs(out - ref_f32)))
    assert jnp.allclose(out, ref_bf16, atol=2e-3, rtol=2e-3), f"bf16-ref max err {err_bf16}"
    assert jnp.allclose(out, ref_f32, atol=3e-2, rtol=3e-2), f"f32-ref max err {err_f32}"

    # --- logits path with bf16 output (optional HBM-write halving) ---
    out_bf16 = final_layer_pallas(x, c, params_dev, return_logits=True,
                                  logits_dtype=jnp.bfloat16)
    out_bf16 = jax.block_until_ready(out_bf16)
    assert out_bf16.shape == (n_b, n_t, n_vocab) and out_bf16.dtype == jnp.bfloat16
    assert jnp.allclose(out_bf16.astype(jnp.float32), ref_bf16, atol=2e-2, rtol=2e-2)

    # --- embedding path (return_logits=False) ---
    emb = final_layer_pallas(x, c, params_dev, return_logits=False)
    emb = jax.block_until_ready(emb)
    ref_emb = final_layer_reference(x, c, params_f32, return_logits=False)
    assert emb.shape == (n_b, n_t, ch)
    assert jnp.allclose(emb, ref_emb, atol=1e-5, rtol=1e-5)

    print("KERNEL_OK")
</pallas_src>

<mosaic_0001>
module attributes {stable_mosaic.version = 11 : i64} {
  func.func @_logits_kernel(%arg0: i32, %arg1: i32, %arg2: i32, %arg3: memref<1x8x32xf32, #tpu.memory_space<vmem>>, %arg4: memref<1x1x32xf32, #tpu.memory_space<vmem>>, %arg5: memref<1x1x32xf32, #tpu.memory_space<vmem>>, %arg6: memref<128x32xbf16, #tpu.memory_space<vmem>>, %arg7: memref<1x128xf32, #tpu.memory_space<vmem>>, %arg8: memref<1x8x128xf32, #tpu.memory_space<vmem>>, %arg9: memref<8x32xbf16, #tpu.memory_space<vmem>>) attributes {dimension_semantics = [#tpu.dimension_semantics<parallel>, #tpu.dimension_semantics<parallel>, #tpu.dimension_semantics<arbitrary>], iteration_bounds = array<i64: 2, 1, 1>, scalar_prefetch = 0 : i64, scratch_operands = 1 : i64, tpu.core_type = #tpu.core_type<tc>, window_params = [{transform_indices = @transform_0, window_bounds = array<i64: 1, 8, 32>}, {transform_indices = @transform_1, window_bounds = array<i64: 1, 1, 32>}, {transform_indices = @transform_2, window_bounds = array<i64: 1, 1, 32>}, {transform_indices = @transform_3, window_bounds = array<i64: 128, 32>}, {transform_indices = @transform_4, window_bounds = array<i64: 1, 128>}, {transform_indices = @transform_5, window_bounds = array<i64: 1, 8, 128>}]} {
    %c0_i32 = arith.constant 0 : i32
    %0 = arith.cmpi eq, %arg2, %c0_i32 : i32
    %1 = arith.extui %0 : i1 to i32
    %c0_i32_0 = arith.constant 0 : i32
    %2 = arith.cmpi ne, %1, %c0_i32_0 : i32
    scf.if %2 {
      %c0_9 = arith.constant 0 : index
      %c0_10 = arith.constant 0 : index
      %c0_11 = arith.constant 0 : index
      %12 = vector.load %arg3[%c0_9, %c0_10, %c0_11] : memref<1x8x32xf32, #tpu.memory_space<vmem>>, vector<1x8x32xf32>
      %13 = vector.shape_cast %12 : vector<1x8x32xf32> to vector<8x32xf32>
      %cst_12 = arith.constant dense<0.000000e+00> : vector<8xf32>
      %14 = vector.multi_reduction <add>, %13, %cst_12 [1] : vector<8x32xf32> to vector<8xf32>
      %15 = vector.shape_cast %14 : vector<8xf32> to vector<8x1xf32>
      %cst_13 = arith.constant 3.200000e+01 : f32
      %16 = vector.broadcast %cst_13 : f32 to vector<8x1xf32>
      %17 = arith.divf %15, %16 : vector<8x1xf32>
      %18 = arith.mulf %13, %13 : vector<8x32xf32>
      %cst_14 = arith.constant dense<0.000000e+00> : vector<8xf32>
      %19 = vector.multi_reduction <add>, %18, %cst_14 [1] : vector<8x32xf32> to vector<8xf32>
      %20 = vector.shape_cast %19 : vector<8xf32> to vector<8x1xf32>
      %cst_15 = arith.constant 3.200000e+01 : f32
      %21 = vector.broadcast %cst_15 : f32 to vector<8x1xf32>
      %22 = arith.divf %20, %21 : vector<8x1xf32>
      %23 = arith.mulf %17, %17 : vector<8x1xf32>
      %24 = arith.subf %22, %23 : vector<8x1xf32>
      %25 = vector.broadcast %17 : vector<8x1xf32> to vector<8x32xf32>
      %26 = arith.subf %13, %25 : vector<8x32xf32>
      %cst_16 = arith.constant 9.99999997E-7 : f32
      %27 = vector.broadcast %cst_16 : f32 to vector<8x1xf32>
      %28 = arith.addf %24, %27 : vector<8x1xf32>
      %29 = math.rsqrt %28 : vector<8x1xf32>
      %30 = vector.broadcast %29 : vector<8x1xf32> to vector<8x32xf32>
      %31 = arith.mulf %26, %30 : vector<8x32xf32>
      %c0_17 = arith.constant 0 : index
      %c0_18 = arith.constant 0 : index
      %c0_19 = arith.constant 0 : index
      %32 = vector.load %arg5[%c0_17, %c0_18, %c0_19] : memref<1x1x32xf32, #tpu.memory_space<vmem>>, vector<1x1x32xf32>
      %33 = vector.shape_cast %32 : vector<1x1x32xf32> to vector<1x32xf32>
      %34 = vector.broadcast %33 : vector<1x32xf32> to vector<8x32xf32>
      %35 = arith.mulf %31, %34 : vector<8x32xf32>
      %c0_20 = arith.constant 0 : index
      %c0_21 = arith.constant 0 : index
      %c0_22 = arith.constant 0 : index
      %36 = vector.load %arg4[%c0_20, %c0_21, %c0_22] : memref<1x1x32xf32, #tpu.memory_space<vmem>>, vector<1x1x32xf32>
      %37 = vector.shape_cast %36 : vector<1x1x32xf32> to vector<1x32xf32>
      %38 = vector.broadcast %37 : vector<1x32xf32> to vector<8x32xf32>
      %39 = arith.addf %35, %38 : vector<8x32xf32>
      %40 = arith.truncf %39 : vector<8x32xf32> to vector<8x32xbf16>
      %c0_23 = arith.constant 0 : index
      %c0_24 = arith.constant 0 : index
      %41 = vector.load %arg9[%c0_23, %c0_24] : memref<8x32xbf16, #tpu.memory_space<vmem>>, vector<8x32xbf16>
      tpu.vector_store %arg9[%c0_23, %c0_24], %40 {strides = array<i32>} : memref<8x32xbf16, #tpu.memory_space<vmem>>, vector<8x32xbf16>,
    } else {
    }
    %c0 = arith.constant 0 : index
    %c0_1 = arith.constant 0 : index
    %3 = vector.load %arg9[%c0, %c0_1] : memref<8x32xbf16, #tpu.memory_space<vmem>>, vector<8x32xbf16>
    %c0_2 = arith.constant 0 : index
    %c0_3 = arith.constant 0 : index
    %4 = vector.load %arg6[%c0_2, %c0_3] : memref<128x32xbf16, #tpu.memory_space<vmem>>, vector<128x32xbf16>
    %cst = arith.constant dense<0.000000e+00> : vector<8x128xf32>
    %5 = tpu.matmul %3, %4, %cst {dimension_numbers = #tpu.dot_dimension_numbers<[1], [1], [0], [0], [0, 0, 1, 0], [], []>} : vector<8x32xbf16>, vector<128x32xbf16>, vector<8x128xf32> -> vector<8x128xf32>
    %c0_4 = arith.constant 0 : index
    %c0_5 = arith.constant 0 : index
    %6 = vector.load %arg7[%c0_4, %c0_5] : memref<1x128xf32, #tpu.memory_space<vmem>>, vector<1x128xf32>
    %7 = vector.broadcast %6 : vector<1x128xf32> to vector<8x128xf32>
    %8 = arith.addf %5, %7 : vector<8x128xf32>
    %c0_6 = arith.constant 0 : index
    %c0_7 = arith.constant 0 : index
    %c0_8 = arith.constant 0 : index
    %9 = vector.load %arg8[%c0_6, %c0_7, %c0_8] : memref<1x8x128xf32, #tpu.memory_space<vmem>>, vector<1x8x128xf32>
    %10 = vector.shape_cast %9 : vector<1x8x128xf32> to vector<8x128xf32>
    %11 = vector.shape_cast %8 : vector<8x128xf32> to vector<1x8x128xf32>
    tpu.vector_store %arg8[%c0_6, %c0_7, %c0_8], %11 {strides = array<i32>} : memref<1x8x128xf32, #tpu.memory_space<vmem>>, vector<1x8x128xf32>,
    return
  }
  func.func @transform_0(%arg0: i32, %arg1: i32, %arg2: i32) -> (i32, i32, i32) {
    %c0_i32 = arith.constant 0 : i32
    %c0_i32_0 = arith.constant 0 : i32
    return %arg0, %arg1, %c0_i32 : i32, i32, i32
  }
  func.func @transform_1(%arg0: i32, %arg1: i32, %arg2: i32) -> (i32, i32, i32) {
    %c0_i32 = arith.constant 0 : i32
    %c0_i32_0 = arith.constant 0 : i32
    %c0_i32_1 = arith.constant 0 : i32
    return %arg0, %c0_i32, %c0_i32_0 : i32, i32, i32
  }
  func.func @transform_2(%arg0: i32, %arg1: i32, %arg2: i32) -> (i32, i32, i32) {
    %c0_i32 = arith.constant 0 : i32
    %c0_i32_0 = arith.constant 0 : i32
    %c0_i32_1 = arith.constant 0 : i32
    return %arg0, %c0_i32, %c0_i32_0 : i32, i32, i32
  }
  func.func @transform_3(%arg0: i32, %arg1: i32, %arg2: i32) -> (i32, i32) {
    %c0_i32 = arith.constant 0 : i32
    %c0_i32_0 = arith.constant 0 : i32
    return %arg2, %c0_i32 : i32, i32
  }
  func.func @transform_4(%arg0: i32, %arg1: i32, %arg2: i32) -> (i32, i32) {
    %c0_i32 = arith.constant 0 : i32
    %c0_i32_0 = arith.constant 0 : i32
    return %c0_i32, %arg2 : i32, i32
  }
  func.func @transform_5(%arg0: i32, %arg1: i32, %arg2: i32) -> (i32, i32, i32) {
    %c0_i32 = arith.constant 0 : i32
    return %arg0, %arg1, %arg2 : i32, i32, i32
  }
}

</mosaic_0001>

<bundles_post_ra>
// kernel: tpu_custom_call.1
= control target key start
LH: loop header
LB: loop body
LE: loop exit
PB: predicated region body
PF: predicated region fallthrough
CT: control target
= control target key end

     0   :  { %10 = vsyncpa [#allocation4], 0  ;;  %s1024_s0 = inlined_call_operand.vmem [shape: f32[2,8,32], index: 0, kind: input, shape index: {}]   ;;  %s1025_s1 = inlined_call_operand.vmem [shape: f32[2,1,32], index: 1, kind: input, shape index: {}]   ;;  %s1026_s2 = inlined_call_operand.vmem [shape: f32[2,1,32], index: 2, kind: input, shape index: {}]   ;;  %s1027_s3 = inlined_call_operand.vmem [shape: bf16[128,32], index: 3, kind: input, shape index: {}]   ;;  %s1028_s4 = inlined_call_operand.vmem [shape: f32[1,128], index: 4, kind: input, shape index: {}]   ;;  %s1029_s5 = inlined_call_operand.hbm [shape: f32[2,8,128], index: 5, kind: output, shape index: {}]  }
   0x1   :  { %12 = vsyncpa [#allocation4 + $0x1], 0  ;;  %s863_s18 = smov 0   ;;  %s865_s19 = smov 0  }
   0x2   :  { %s867_s20 = smov 0   ;;  %s869_s21 = smov 0  }
   0x3   :  { %s871_s22 = smov 0   ;;  %s873_s23 = smov 0  }
   0x4 LB: > { %s629_s24 = sadd.s32 4294967295, %s828_s23   ;;  %s630_s25 = sadd.s32 4294967294, %s828_s23   ;;  %s828_s23 = sphi %s873_s23, %s18_s23   ;;  %s824_s22 = sphi %s871_s22, %s1036_s22   ;;  %s820_s21 = sphi %s869_s21, %s1035_s21   ;;  %s816_s20 = sphi %s867_s20, %s1034_s20   ;;  %s812_s19 = sphi %s865_s19, %s1033_s19   ;;  %s808_s18 = sphi %s863_s18, %s1032_s18  }
   0x5   : > { %s37_s26 = sadd.s32 1, %s824_s22  ;;  %s180_s27 = sadd.s32 1, %s816_s20 }
   0x6   : > { %p39_p0 = scmp.ge.s32.totalorder %s37_s26, 2  ;;  %p190_p1 = scmp.ne.s32.totalorder %s816_s20, %s812_s19 }
   0x7   : > { %p191_p2 = scmp.eq.s32.totalorder %s629_s24, 1  ;;  %p196_p3 = scmp.ne.s32.totalorder %s812_s19, %s808_s18 }
   0x8   : > { %s1038_s26 = smov (%p39_p0, %s37_s26), 0  ;;  %p197_p5 = scmp.eq.s32.totalorder %s630_s25, 1 }
   0x9   : > { %p903_p4 = por %p191_p2, %p190_p1  ;;  %s173_s29 = ssub.s32 %s824_s22, %s1038_s26 }
   0xa   : > { %p635_p6 = scmp.ge.s32.totalorder %s828_s23, 1  ;;  %p178_p7 = scmp.eq.s32.totalorder %s173_s29, 0 }
   0xb   : > { %p910_p8 = por %p197_p5, %p196_p3  ;;  %p252_p9 = scmp.lt.s32.totalorder %s828_s23, 3 }
   0xc   : > { %s916_s6 = scalar_select %p178_p7, %s816_s20, %s180_s27  }
   0xd   : > { %p253_p10 = pnand %p635_p6, %p252_p9 }
   0xe   : > { %p296_p11 = scmp.lt.s32.totalorder (!%p253_p10), %s820_s21, 1  ;;  %vm324_vm0 = vcmask (!%p253_p10), 261120   ;;  %v740_v0 = vld [vmem:[%s1027_s3] sm:$0xff] (!%p253_p10)   ;;  %v830_v1 = vmov (!%p253_p10), 0.0   ;;  %v741_v3 = vld [vmem:[%s1027_s3 + $0x8] sm:$0xff] (!%p253_p10)   ;;  %v742_v9 = vld [vmem:[%s1027_s3 + $0x10] sm:$0xff] (!%p253_p10)  }
   0xf   : > { %256 = sbr.rel (%p253_p10) target bundleno = 435 (0x1b3), region = 40  ;;  %663 = vmatprep.subr.bf16.mxu0 (!%p253_p10), %v830_v1  ;;  %v429_v2 = vsel (!%p253_p10), %vm324_vm0, %v740_v0, 0  ;;  %v432_v7 = vsel (!%p253_p10), %vm324_vm0, %v741_v3, 0  ;;  %v435_v10 = vsel (!%p253_p10), %vm324_vm0, %v742_v9, 0  ;;  %v743_v11 = vld [vmem:[%s1027_s3 + $0x18] sm:$0xff] (!%p253_p10)   ;;  %v744_v13 = vld [vmem:[%s1027_s3 + $0x20] sm:$0xff] (!%p253_p10)  }
  0x10   : > { %664 = vmatpush3.bf16.xpose.msra.mxu0 (!%p253_p10), %v429_v2  ;;  %v438_v12 = vsel (!%p253_p10), %vm324_vm0, %v743_v11, 0  ;;  %v441_v14 = vsel (!%p253_p10), %vm324_vm0, %v744_v13, 0  ;;  %v745_v15 = vld [vmem:[%s1027_s3 + $0x28] sm:$0xff] (!%p253_p10)   ;;  %v746_v17 = vld [vmem:[%s1027_s3 + $0x30] sm:$0xff] (!%p253_p10)   ;;  %v747_v19 = vld [vmem:[%s1027_s3 + $0x38] sm:$0xff] (!%p253_p10)   ;;  %vm831_vm1 = vmmov (!%p253_p10), 0  }
  0x11   : > { %665 = vmatprep.subr.bf16.mxu0 (!%p253_p10), %v830_v1  ;;  %v444_v16 = vsel (!%p253_p10), %vm324_vm0, %v745_v15, 0  ;;  %v447_v18 = vsel (!%p253_p10), %vm324_vm0, %v746_v17, 0  ;;  %679 = vmatprep.mubr.msk.bf16.mxu0 (!%p253_p10), %vm831_vm1, %v830_v1  ;;  %v450_v20 = vsel (!%p253_p10), %vm324_vm0, %v747_v19, 0  ;;  %vm358_vm2 = vcmask (!%p253_p10), 257024   ;;  %s293_s27 = sand.u32 (!%p253_p10), 1, %s812_s19  }
  0x12   : > { %s636_s29 = sshll.u32 (!%p253_p10), %s293_s27, 3  ;;  %v640_v37 = vld [vmem:[%s1028_s4] ss:$0 sm:$0xff] (!%p253_p10) }
  0x16   : > { %s923_s9 = scalar_select %p296_p11, %s820_s21, 1 }
  0x18   : > { %s637_s10 = sshll.u32 %s923_s9, 3  ;;  %666 = vmatpush3.bf16.xpose.msra.mxu0 %v432_v7  ;;  %s308_s16 = scalar_lea.vmem %s1026_s2, %s923_s9 }
  0x19   : > { %s302_s15 = scalar_lea.vmem %s1024_s0, %s637_s10  ;;  %667 = vmatprep.subr.bf16.mxu0 %v830_v1  ;;  %s305_s25 = scalar_lea.vmem %s1025_s1, %s923_s9  ;;  %v638_v30 = vld [vmem:[%s308_s16] ss:$0 sm:$0xff] }
  0x1a   : > { %v323_v4 = vld [vmem:[%s302_s15] sm:$0xff]  ;;  %s651_s9 = sshll.u32 %s820_s21, 7  ;;  %s295_s10 = scalar_lea.vmem [#allocation3], %s636_s29 }
  0x1b   : > { %v325_v5 = vsel %vm324_vm0, %v323_v4, 0.0  ;;  %v330_v6 = vmul.f32 %v323_v4, %v323_v4  ;;  %v639_v32 = vld [vmem:[%s305_s25] ss:$0 sm:$0xff]  ;;  %s509_s11 = sshll.u32 %s295_s10, 4  ;;  %s977_s14 = scalar_lea.hbm %s1029_s5, %s651_s9  ;;  %s979_s11 = int_to_ptr.vmem [resolvable:$true] %s509_s11 }
  0x1c   : > { %326 = vadd.xlane.f32.xlu0 %v325_v5  ;;  %s494_s15 = scalar_lea.sflag [#allocation4], %s293_s27  ;;  %s750_s21 = scalar_lea.vmem %s979_s11, 128 }
  0x1d   : > { %v331_v8 = vsel %vm324_vm0, %v330_v6, 0.0  ;;  %p751_p12 = scmp.ne.s32.totalorder %s979_s11, %s750_s21  ;;  %s832_s16 = smov [#allocation3]  }
  0x1e   : > { %s754_s17 = sshll.u32 %s832_s16, 4  ;;  %s755_s17 = int_to_ptr.vmem [resolvable:$false] %s754_s17 }
  0x1f   : > { %p752_p13 = pnand %p751_p12, %p903_p4  ;;  %s756_s24 = scalar_lea.vmem %s755_s17, 256 }
  0x20   : > { %332 = vadd.xlane.f32.xlu0 %v331_v8  ;;  %668 = vmatpush3.bf16.xpose.msra.mxu0 %v435_v10  ;;  %p757_p1 = scmp.lt.s32.totalorder %s979_s11, %s755_s17  ;;  %p758_p2 = scmp.lt.s32.totalorder %s756_s24, %s750_s21 }
  0x21   : > { %669 = vmatprep.subr.bf16.mxu0 %v830_v1  ;;  %p753_p0 = pneg %p752_p13 }
  0x22   : > { %p759_p3 = por %p758_p2, %p757_p1 }
  0x24   : > { %p760_p5 = pnand %p759_p3, %p753_p0 }
  0x28   : > { %670 = vmatpush3.bf16.xpose.msra.mxu0 %v438_v12 }
  0x29   : > { %671 = vmatprep.subr.bf16.mxu0 %v830_v1 }
  0x30   : > { %672 = vmatpush3.bf16.xpose.msra.mxu0 %v441_v14 }
  0x31   : > { %673 = vmatprep.subr.bf16.mxu0 %v830_v1 }
  0x38   : > { %674 = vmatpush3.bf16.xpose.msra.mxu0 %v444_v16 }
  0x39   : > { %675 = vmatprep.subr.bf16.mxu0 %v830_v1 }
  0x40   : > { %676 = vmatpush3.bf16.xpose.msra.mxu0 %v447_v18 }
  0x41   : > { %677 = vmatprep.subr.bf16.mxu0 %v830_v1 }
  0x48   : > { %678 = vmatpush3.bf16.xpose.msra.mxu0 %v450_v20 }
  0xa9   : > { %v327_v21 = vpop.xlane.xlu0 %326 }
  0xaa   : > { %v329_v22 = vmul.f32 0.03125, %v327_v21 }
  0xac   : > { %v335_v24 = vmul.f32 %v329_v22, %v329_v22  ;;  %v337_v28 = vsub.f32 %v323_v4, %v329_v22 }
  0xad   : > { %v333_v23 = vpop.xlane.xlu0 %332 }
  0xae   : > { %v334_v25 = vmul.f32 0.03125, %v333_v23 }
  0xb0   : > { %v336_v26 = vsub.f32 %v334_v25, %v335_v24 }
  0xb2   : > { %v338_v27 = vadd.f32 1e-06, %v336_v26 }
  0xb4   : > { %748 = vrsqrt.f32 %v338_v27 }
  0xbe   : > { %v749_v29 = vpop.eup %748 }
  0xbf   : > { %v340_v31 = vmul.f32 %v749_v29, %v337_v28 }
  0xc1   : > { %v348_v33 = vmul.f32 %v638_v30, %v340_v31 }
  0xc3   : > { %v356_v34 = vadd.f32 %v639_v32, %v348_v33 }
  0xc5   : > { %v357_v35 = vpack.c.bf16 %v356_v34, %v356_v34 }
  0xc7   : > { %359 = vst.msk [vmem:[#allocation2] sm:$0xf] %vm358_vm2, %v357_v35 }
  0xce   : > { %v360_v36 = vld [vmem:[#allocation2] sm:$0xf] }
  0xcf   : > { %680 = vmatmul.mubr.msk.bf16.vlgmr.msra.gmra.mrb[0].mxu0 %vm324_vm0, %v360_v36 }
 0x1a2   : > { %v486_v38 = vpop.f32.mrb[0].mxu0 }
 0x1a3   : > { %v487_v39 = vadd.f32 %v640_v37, %v486_v38  ;;  %v681_v40 = vpop.f32.mrb[1].mxu0 }
 0x1a4   : > { %v489_v41 = vpop.f32.mrb[2].mxu0 }
 0x1a5   : > { %492 = vst [vmem:[%s295_s10] sm:$0xff] %v487_v39  ;;  %v682_v42 = vpop.f32.mrb[3].mxu0 }
 0x1a6   : > { %763 = shalt.err (!%p760_p5)
}
 0x1a7   : > { %s764_s25 = scalar_lea.hbm %s977_s14, 128  ;;  %s768_s7 = scalar_lea.hbm %s1029_s5, 256 }
 0x1a8   : > { %p765_p6 = scmp.ne.s32.totalorder %s977_s14, %s764_s25  ;;  %p769_p10 = scmp.lt.u32.totalorder %s977_s14, %s1029_s5 }
 0x1a9   : > { %p770_p11 = scmp.lt.u32.totalorder %s768_s7, %s764_s25  ;;  %p772_p13 = scmp.lt.u32.totalorder %s764_s25, %s977_s14 }
 0x1aa   : > { %p766_p7 = pnand %p765_p6, %p903_p4 }
 0x1ab   : > { %p771_p12 = por %p770_p11, %p769_p10 }
 0x1ac   : > { %p767_p9 = pneg %p766_p7 }
 0x1ad   : > { %p773_p0 = por %p772_p13, %p771_p12 }
 0x1af   : > { %p774_p1 = pnand %p773_p0, %p767_p9 }
 0x1b1   : > { %777 = shalt.err (!%p774_p1)
}
 0x1b2   : > { %683 = dma.vmem_to_hbm [thread:$0]  (%p903_p4), %s979_s11, 128, %s977_s14, %s494_s15  }
 0x1b3 PF: > { %p689_p2 = scmp.ge.s32.totalorder %s828_s23, 2  ;;  %s521_s10 = sand.u32 1, %s808_s18  }
 0x1b4   : > { %s522_s12 = scalar_lea.sflag [#allocation4], %s521_s10 }
 0x1b5   : > { %p686_p3 = pnand %p689_p2, %p910_p8 }
 0x1b7   : > { %803 = dma.done.wait (!%p686_p3), %s522_s12, 128  }
 0x1b8   : > { %805 = vsyncadd (!%p686_p3), %s522_s12, 4294967168  ;;  %s18_s23 = sadd.s32 1, %s828_s23   ;;  %s1032_s18 = smov %s812_s19 }
 0x1b9   : > { %p15_p5 = scmp.ge.s32.totalorder %s18_s23, 4   ;;  %s1033_s19 = smov %s816_s20 }
 0x1ba   : > { %s1034_s20 = smov %s916_s6  ;;  %s1035_s21 = smov %s824_s22 }
 0x1bb   : > { %s1036_s22 = smov %s1038_s26  ;;  %17 = sbr.rel (!%p15_p5) target bundleno = 4 (0x4), region = 91 }
 0x1c2   :  { %527 = vsyncpa [#allocation4], 1 }
 0x1c3   :  { %529 = vsyncpa [#allocation4 + $0x1], 1 }

</bundles_post_ra>
